<compile_context>
chip_gen: v6e
topology: v6e:2x2x1
jax: 0.10.0
libtpu: 0.0.40
codegen_flags: <defaults>
</compile_context>

<pallas_src>
import functools

import jax
import jax.numpy as jnp
import numpy as np
from jax.experimental import pallas as pl
from jax.experimental.pallas import tpu as pltpu

_EPS = 1e-5  # nn.BatchNorm2d default eps


def _hw_config():
    """Return (per-block byte budget, vmem_limit_bytes) sized per TPU generation."""
    vmem = None
    try:
        vmem = getattr(pltpu.get_tpu_info(), "vmem_capacity_bytes", None)
    except Exception:
        vmem = None
    if vmem is None:
        vmem = 64 * 1024 * 1024            # conservative default (v7x-sized VMEM)
    if vmem >= 100 * 1024 * 1024:          # v5e / v6e: 128 MiB VMEM
        return 4 * 1024 * 1024, 96 * 1024 * 1024
    return 2 * 1024 * 1024, 48 * 1024 * 1024   # v7x: 64 MiB VMEM


def _choose_tiles(R, S, itemsize, block_bytes):
    """Pick (r_tile, s_tile) for the [R, S] view. Grids use pl.cdiv (ragged ok)."""
    # dtype-aware sublane quantum: 8 rows for 4-byte, 16 for 2-byte, 32 for 1-byte.
    quantum = max(8, 32 // max(1, itemsize))
    if R <= quantum:
        r_tile = R                          # full (possibly under-filled) sublane dim
    else:
        # Multiple of the quantum, capped, and preferring >= 2 row blocks so the
        # v7x megacore has work on the only "parallel" axis of the stats pass.
        r_cap = 64 * (quantum // 8)
        half = (R // 2) // quantum * quantum
        r_tile = max(quantum, min(r_cap, max(half, quantum)))
    if S <= 128:
        s_tile = S                          # full (unblocked) lane dim
    else:
        lanes = max(128, (block_bytes // (r_tile * itemsize)) // 128 * 128)
        s_tile = min((S // 128) * 128, lanes)
    return r_tile, s_tile


def _stats_kernel(x_ref, sum_ref, sumsq_ref, acc_ref, accsq_ref,
                  *, S, r_tile, s_tile, acc_width):
    """Per-row sum(x) and sum(x*x), reduced over the spatial grid axis."""
    n_chunks = s_tile // acc_width
    ragged = (S % s_tile) != 0             # static: spatial tail needs masking
    si = pl.program_id(1)
    last = pl.num_programs(1) - 1

    @pl.when(si == 0)
    def _():
        acc_ref[...] = jnp.zeros_like(acc_ref)
        accsq_ref[...] = jnp.zeros_like(accsq_ref)

    def add_chunk(k, part, part_sq, limit=None):
        start = k * acc_width
        if not isinstance(start, int):
            start = pl.multiple_of(start, acc_width)
        c = x_ref[:, pl.ds(start, acc_width)].astype(jnp.float32)
        if limit is not None:
            col = jax.lax.broadcasted_iota(jnp.int32, (r_tile, acc_width), 1)
            c = jnp.where(col + k * acc_width < limit, c, 0.0)
        return part + c, part_sq + c * c

    def accumulate(limit=None):
        # Lane-chunked reduction into register partials: ~1 vld + 3 VALU per
        # x-vreg; the VMEM accumulator is touched once per grid step only.
        zero = jnp.zeros((r_tile, acc_width), jnp.float32)
        if n_chunks <= 8:
            part, part_sq = zero, zero
            for k in range(n_chunks):
                part, part_sq = add_chunk(k, part, part_sq, limit)
        else:
            part, part_sq = jax.lax.fori_loop(
                0, n_chunks,
                lambda k, carry: add_chunk(k, *carry, limit),
                (zero, zero))
        acc_ref[...] += part
        accsq_ref[...] += part_sq

    if ragged:
        @pl.when(si == last)
        def _():
            accumulate(limit=S - si * s_tile)   # zero contributions past S

        @pl.when(si != last)
        def _():
            accumulate()
    else:
        accumulate()

    @pl.when(si == last)
    def _():
        # Single cross-lane (XLU) reduce of just acc_width lanes per row block.
        sum_ref[...] = jnp.sum(acc_ref[...], axis=1, keepdims=True)
        sumsq_ref[...] = jnp.sum(accsq_ref[...], axis=1, keepdims=True)


def _norm_relu_kernel(x_ref, scale_ref, bias_ref, o_ref):
    """out = relu(x * scale_r + bias_r) with precomputed per-row scale/bias."""
    x = x_ref[...].astype(jnp.float32)       # (r_tile, s_tile)
    y = x * scale_ref[...] + bias_ref[...]   # (r_tile, 1) lane-broadcast
    o_ref[...] = jnp.maximum(y, 0.0).astype(o_ref.dtype)


def batch_norm_and_activate(x, gamma, beta, eps=_EPS):
    """x: [N, C, F, T]. gamma, beta: [C]. Returns relu(batchnorm(x)) in x.dtype."""
    N, C, F, T = x.shape
    S = F * T
    R = N * C
    M = N * S
    x2 = x.reshape(R, S)                     # free view of contiguous NCHW

    block_bytes, vmem_limit = _hw_config()
    itemsize = np.dtype(x.dtype).itemsize
    r_tile, s_tile = _choose_tiles(R, S, itemsize, block_bytes)
    acc_width = 128 if s_tile % 128 == 0 else s_tile
    grid = (pl.cdiv(R, r_tile), pl.cdiv(S, s_tile))

    x_spec = pl.BlockSpec((r_tile, s_tile), lambda ri, si: (ri, si))
    row_spec = pl.BlockSpec((r_tile, 1), lambda ri, si: (ri, 0))

    # ---- Pass 1: per-row sum / sum-of-squares --------------------------------
    stats = functools.partial(_stats_kernel, S=S, r_tile=r_tile,
                              s_tile=s_tile, acc_width=acc_width)
    sum_rows, sumsq_rows = pl.pallas_call(
        stats,
        grid=grid,
        in_specs=[x_spec],
        out_specs=(row_spec, row_spec),
        out_shape=(jax.ShapeDtypeStruct((R, 1), jnp.float32),
                   jax.ShapeDtypeStruct((R, 1), jnp.float32)),
        scratch_shapes=[pltpu.VMEM((r_tile, acc_width), jnp.float32),
                        pltpu.VMEM((r_tile, acc_width), jnp.float32)],
        compiler_params=pltpu.CompilerParams(
            dimension_semantics=("parallel", "arbitrary"),
            vmem_limit_bytes=vmem_limit),
    )(x2)

    # ---- Tiny per-channel math (plain XLA, negligible) -----------------------
    # Note: variance via E[x^2] - mean^2 in f32; clamp guards rounding. This can
    # lose accuracy vs two-pass for data with |mean| >> std, but matches PyTorch
    # to ~1e-5 for typical activations.
    g = gamma.astype(jnp.float32)
    b = beta.astype(jnp.float32)
    sum_c = jnp.sum(sum_rows.reshape(N, C), axis=0)
    sumsq_c = jnp.sum(sumsq_rows.reshape(N, C), axis=0)
    mean = sum_c / M
    var = jnp.maximum(sumsq_c / M - mean * mean, 0.0)
    inv_std = jax.lax.rsqrt(var + eps)
    scale_c = g * inv_std
    bias_c = b - mean * scale_c
    scale_rows = jnp.tile(scale_c, (N,)).reshape(R, 1)   # row r -> channel r % C
    bias_rows = jnp.tile(bias_c, (N,)).reshape(R, 1)

    # ---- Pass 2: normalize + ReLU --------------------------------------------
    out2 = pl.pallas_call(
        _norm_relu_kernel,
        grid=grid,
        in_specs=[x_spec, row_spec, row_spec],
        out_specs=x_spec,
        out_shape=jax.ShapeDtypeStruct((R, S), x.dtype),
        compiler_params=pltpu.CompilerParams(
            dimension_semantics=("parallel", "parallel"),
            vmem_limit_bytes=vmem_limit),
    )(x2, scale_rows, bias_rows)

    return out2.reshape(N, C, F, T)


def _reference(x, gamma, beta, eps=_EPS):
    mean = jnp.mean(x, axis=(0, 2, 3), keepdims=True)
    var = jnp.mean((x - mean) ** 2, axis=(0, 2, 3), keepdims=True)
    y = (x - mean) / jnp.sqrt(var + eps)
    y = y * gamma.reshape(1, -1, 1, 1) + beta.reshape(1, -1, 1, 1)
    return jnp.maximum(y, 0.0)


if __name__ == "__main__":
    key = jax.random.PRNGKey(0)
    kx, kg, kb, kx2 = jax.random.split(key, 4)

    # Main case: [N, C, F, T] = [2, 4, 16, 16]  (S divisible by 128)
    N, C, F, T = 2, 4, 16, 16
    x = jax.random.normal(kx, (N, C, F, T), dtype=jnp.float32)
    gamma = 1.0 + 0.1 * jax.random.normal(kg, (C,), dtype=jnp.float32)
    beta = 0.1 * jax.random.normal(kb, (C,), dtype=jnp.float32)

    out = jax.block_until_ready(batch_norm_and_activate(x, gamma, beta))
    ref = _reference(x, gamma, beta)
    np.testing.assert_allclose(np.asarray(out), np.asarray(ref), rtol=1e-5, atol=1e-5)

    # Ragged-spatial case: S = 10*13 = 130 exercises the cdiv grid + tail masking.
    Fr, Tr = 10, 13
    xr = jax.random.normal(kx2, (N, C, Fr, Tr), dtype=jnp.float32)
    out_r = jax.block_until_ready(batch_norm_and_activate(xr, gamma, beta))
    ref_r = _reference(xr, gamma, beta)
    np.testing.assert_allclose(np.asarray(out_r), np.asarray(ref_r), rtol=1e-5, atol=1e-5)

    print("KERNEL_OK")
</pallas_src>

<mosaic_0001>
module attributes {stable_mosaic.version = 11 : i64} {
  func.func @_stats_kernel(%arg0: i32, %arg1: i32, %arg2: memref<8x256xf32, #tpu.memory_space<vmem>>, %arg3: memref<8x1xf32, #tpu.memory_space<vmem>>, %arg4: memref<8x1xf32, #tpu.memory_space<vmem>>, %arg5: memref<8x128xf32, #tpu.memory_space<vmem>>, %arg6: memref<8x128xf32, #tpu.memory_space<vmem>>) attributes {dimension_semantics = [#tpu.dimension_semantics<parallel>, #tpu.dimension_semantics<arbitrary>], iteration_bounds = array<i64: 1, 1>, scalar_prefetch = 0 : i64, scratch_operands = 2 : i64, tpu.core_type = #tpu.core_type<tc>, window_params = [{transform_indices = @transform_0, window_bounds = array<i64: 8, 256>}, {transform_indices = @transform_1, window_bounds = array<i64: 8, 1>}, {transform_indices = @transform_2, window_bounds = array<i64: 8, 1>}]} {
    %c0_i32 = arith.constant 0 : i32
    %0 = arith.cmpi eq, %arg1, %c0_i32 : i32
    %1 = arith.extui %0 : i1 to i32
    %c0_i32_0 = arith.constant 0 : i32
    %2 = arith.cmpi ne, %1, %c0_i32_0 : i32
    scf.if %2 {
      %cst_13 = arith.constant 0.000000e+00 : f32
      %21 = vector.broadcast %cst_13 : f32 to vector<8x128xf32>
      %c0_14 = arith.constant 0 : index
      %c0_15 = arith.constant 0 : index
      %22 = vector.load %arg5[%c0_14, %c0_15] : memref<8x128xf32, #tpu.memory_space<vmem>>, vector<8x128xf32>
      tpu.vector_store %arg5[%c0_14, %c0_15], %21 {strides = array<i32>} : memref<8x128xf32, #tpu.memory_space<vmem>>, vector<8x128xf32>,
      %cst_16 = arith.constant 0.000000e+00 : f32
      %23 = vector.broadcast %cst_16 : f32 to vector<8x128xf32>
      %c0_17 = arith.constant 0 : index
      %c0_18 = arith.constant 0 : index
      %24 = vector.load %arg6[%c0_17, %c0_18] : memref<8x128xf32, #tpu.memory_space<vmem>>, vector<8x128xf32>
      tpu.vector_store %arg6[%c0_17, %c0_18], %23 {strides = array<i32>} : memref<8x128xf32, #tpu.memory_space<vmem>>, vector<8x128xf32>,
    } else {
    }
    %cst = arith.constant 0.000000e+00 : f32
    %3 = vector.broadcast %cst : f32 to vector<8x128xf32>
    %c0 = arith.constant 0 : index
    %c0_1 = arith.constant 0 : index
    %4 = vector.load %arg2[%c0, %c0_1] : memref<8x256xf32, #tpu.memory_space<vmem>>, vector<8x128xf32>
    %5 = arith.addf %3, %4 : vector<8x128xf32>
    %6 = arith.mulf %4, %4 : vector<8x128xf32>
    %7 = arith.addf %3, %6 : vector<8x128xf32>
    %c0_2 = arith.constant 0 : index
    %c128 = arith.constant 128 : index
    %8 = vector.load %arg2[%c0_2, %c128] : memref<8x256xf32, #tpu.memory_space<vmem>>, vector<8x128xf32>
    %9 = arith.addf %5, %8 : vector<8x128xf32>
    %10 = arith.mulf %8, %8 : vector<8x128xf32>
    %11 = arith.addf %7, %10 : vector<8x128xf32>
    %c0_3 = arith.constant 0 : index
    %c0_4 = arith.constant 0 : index
    %12 = vector.load %arg5[%c0_3, %c0_4] : memref<8x128xf32, #tpu.memory_space<vmem>>, vector<8x128xf32>
    %13 = arith.addf %12, %9 : vector<8x128xf32>
    %c0_5 = arith.constant 0 : index
    %c0_6 = arith.constant 0 : index
    %14 = vector.load %arg5[%c0_5, %c0_6] : memref<8x128xf32, #tpu.memory_space<vmem>>, vector<8x128xf32>
    tpu.vector_store %arg5[%c0_5, %c0_6], %13 {strides = array<i32>} : memref<8x128xf32, #tpu.memory_space<vmem>>, vector<8x128xf32>,
    %c0_7 = arith.constant 0 : index
    %c0_8 = arith.constant 0 : index
    %15 = vector.load %arg6[%c0_7, %c0_8] : memref<8x128xf32, #tpu.memory_space<vmem>>, vector<8x128xf32>
    %16 = arith.addf %15, %11 : vector<8x128xf32>
    %c0_9 = arith.constant 0 : index
    %c0_10 = arith.constant 0 : index
    %17 = vector.load %arg6[%c0_9, %c0_10] : memref<8x128xf32, #tpu.memory_space<vmem>>, vector<8x128xf32>
    tpu.vector_store %arg6[%c0_9, %c0_10], %16 {strides = array<i32>} : memref<8x128xf32, #tpu.memory_space<vmem>>, vector<8x128xf32>,
    %c0_i32_11 = arith.constant 0 : i32
    %18 = arith.cmpi eq, %arg1, %c0_i32_11 : i32
    %19 = arith.extui %18 : i1 to i32
    %c0_i32_12 = arith.constant 0 : i32
    %20 = arith.cmpi ne, %19, %c0_i32_12 : i32
    scf.if %20 {
      %c0_13 = arith.constant 0 : index
      %c0_14 = arith.constant 0 : index
      %21 = vector.load %arg5[%c0_13, %c0_14] : memref<8x128xf32, #tpu.memory_space<vmem>>, vector<8x128xf32>
      %cst_15 = arith.constant dense<0.000000e+00> : vector<8xf32>
      %22 = vector.multi_reduction <add>, %21, %cst_15 [1] : vector<8x128xf32> to vector<8xf32>
      %23 = vector.shape_cast %22 : vector<8xf32> to vector<8x1xf32>
      %c0_16 = arith.constant 0 : index
      %c0_17 = arith.constant 0 : index
      %24 = vector.load %arg3[%c0_16, %c0_17] : memref<8x1xf32, #tpu.memory_space<vmem>>, vector<8x1xf32>
      tpu.vector_store %arg3[%c0_16, %c0_17], %23 {strides = array<i32>} : memref<8x1xf32, #tpu.memory_space<vmem>>, vector<8x1xf32>,
      %c0_18 = arith.constant 0 : index
      %c0_19 = arith.constant 0 : index
      %25 = vector.load %arg6[%c0_18, %c0_19] : memref<8x128xf32, #tpu.memory_space<vmem>>, vector<8x128xf32>
      %cst_20 = arith.constant dense<0.000000e+00> : vector<8xf32>
      %26 = vector.multi_reduction <add>, %25, %cst_20 [1] : vector<8x128xf32> to vector<8xf32>
      %27 = vector.shape_cast %26 : vector<8xf32> to vector<8x1xf32>
      %c0_21 = arith.constant 0 : index
      %c0_22 = arith.constant 0 : index
      %28 = vector.load %arg4[%c0_21, %c0_22] : memref<8x1xf32, #tpu.memory_space<vmem>>, vector<8x1xf32>
      tpu.vector_store %arg4[%c0_21, %c0_22], %27 {strides = array<i32>} : memref<8x1xf32, #tpu.memory_space<vmem>>, vector<8x1xf32>,
    } else {
    }
    return
  }
  func.func @transform_0(%arg0: i32, %arg1: i32) -> (i32, i32) {
    %c0_i32 = arith.constant 0 : i32
    return %arg0, %arg1 : i32, i32
  }
  func.func @transform_1(%arg0: i32, %arg1: i32) -> (i32, i32) {
    %c0_i32 = arith.constant 0 : i32
    %c0_i32_0 = arith.constant 0 : i32
    return %arg0, %c0_i32 : i32, i32
  }
  func.func @transform_2(%arg0: i32, %arg1: i32) -> (i32, i32) {
    %c0_i32 = arith.constant 0 : i32
    %c0_i32_0 = arith.constant 0 : i32
    return %arg0, %c0_i32 : i32, i32
  }
}

</mosaic_0001>

<bundles_post_ra>
// kernel: tpu_custom_call.1
= control target key start
LH: loop header
LB: loop body
LE: loop exit
PB: predicated region body
PF: predicated region fallthrough
CT: control target
= control target key end

     0   :  { %8 = vsyncpa [#allocation5], 0  ;;  %s86_s9 = smov [#allocation4]   ;;  %s111_s0 = inlined_call_operand.hbm [shape: f32[8,256], index: 0, kind: input, shape index: {}]   ;;  %s112_s1 = inlined_call_operand.vmem [shape: f32[8,1], index: 1, kind: output, shape index: {0}]   ;;  %s113_s2 = inlined_call_operand.vmem [shape: f32[8,1], index: 2, kind: output, shape index: {1}]  }
   0x1   :  { %s15_s10 = sshll.u32 %s86_s9, 4  ;;  %s16_s10 = int_to_ptr.vmem [resolvable:$true] %s15_s10 }
   0x2   :  { %s72_s11 = scalar_lea.vmem %s16_s10, 256  ;;  %p77_p1 = scmp.lt.s32.totalorder %s16_s10, %s16_s10 }
   0x3   :  { %p73_p0 = scmp.ne.s32.totalorder %s16_s10, %s72_s11  ;;  %p78_p2 = scmp.lt.s32.totalorder %s72_s11, %s72_s11 }
   0x5   :  { %p79_p3 = por %p78_p2, %p77_p1 }
   0x7   :  { %p80_p4 = pnand %p79_p3, %p73_p0 }
   0x9   :  { %83 = shalt.err (!%p80_p4)
}
   0xa   :  { %18 = dma.hbm_to_vmem [thread:$0]  %s111_s0, 256, %s16_s10, [#allocation5]  }
   0xb   :  { %84 = dma.done.wait [#allocation5], 256  }
   0xc   :  { %85 = vsyncadd [#allocation5], 4294967040  ;;  %v28_v0 = vld [vmem:[#allocation4] sm:$0xff]  ;;  %v32_v1 = vld [vmem:[#allocation4 + $0x8] sm:$0xff]  ;;  %vm48_vm0 = vcmask 7168  }
   0xd   :  { %v33_v2 = vadd.f32 %v32_v1, %v28_v0  ;;  %v34_v3 = vmul.f32 %v32_v1, %v32_v1  ;;  %v30_v4 = vmul.f32 %v28_v0, %v28_v0 }
   0xf   :  { %46 = vadd.xlane.f32.xlu0 %v33_v2  ;;  %v35_v5 = vadd.f32 %v34_v3, %v30_v4 }
  0x13   :  { %51 = vadd.xlane.f32.xlu0 %v35_v5 }
  0x98   :  { %v47_v6 = vpop.xlane.xlu0 %46 }
  0x99   :  { %49 = vst.msk [vmem:[%s112_s1] sm:$0xff] %vm48_vm0, %v47_v6 }
  0x9c   :  { %v52_v7 = vpop.xlane.xlu0 %51 }
  0x9d   :  { %53 = vst.msk [vmem:[%s113_s2] sm:$0xff] %vm48_vm0, %v52_v7 }
  0x9e   :  { %62 = vsyncpa [#allocation5], 1 }

</bundles_post_ra>
